<compile_context>
chip_gen: v5e
topology: v5e:2x2
jax: 0.10.0
libtpu: 0.0.40
codegen_flags: <defaults>
</compile_context>

<pallas_src>
import functools

import jax
import jax.numpy as jnp
from jax import lax
from jax.experimental import pallas as pl
from jax.experimental.pallas import tpu as pltpu

_LANE = 128


# --------------------------- generation-aware budgets ---------------------------
def _budgets(s1, s2, lim):
    """VMEM block budgets / scoped limit; conservative when the chip is unknown."""
    try:
        cap = int(getattr(pltpu.get_tpu_info(), "vmem_capacity_bytes", 0))
    except Exception:
        cap = 0
    if cap >= (96 << 20):              # v5e / v6e: 128 MiB physical VMEM
        d1, d2, dlim = 6 << 20, 6 << 20, 64 << 20
    else:                              # v7x (64 MiB per TC) or unknown backend
        d1, d2, dlim = 3 << 20, 3 << 20, 40 << 20
    return (s1 or d1, s2 or d2, lim or dlim)


def _stage1_tiles(N, c, HW, bpe, budget_bytes):
    """Pick (Nb, t_hw) for the stage-1 streaming block (Nb, 1, c, t_hw)."""
    row_bytes = c * bpe
    if HW * row_bytes <= budget_bytes:
        t_hw = HW                                   # full dim: no 128 constraint
    else:
        t_hw = max(_LANE, (budget_bytes // row_bytes) // _LANE * _LANE)
    nb = 1
    per_n = c * t_hw * bpe
    for k in range(N, 0, -1):                       # fold an N-block (bigger DMAs)
        if N % k == 0 and k * per_n <= budget_bytes:
            nb = k
            break
    return nb, t_hw


def _pick_tb(N, G, c, HW, bpe, budget_bytes, min_steps=4):
    """Rows per stage-2 grid step.

    Prefers TB = k*G (group params can be statically tiled inside the kernel),
    else TB dividing G (dynamic group slice of the resident params).  TB is
    capped so the grid keeps >= min_steps steps (megacore + pipeline overlap).
    """
    NB = N * G
    per_row = c * HW * bpe
    target = min(NB, max(1, min_steps))
    for k in range(N, 0, -1):
        if N % k == 0 and (N // k) >= target and k * G * per_row <= budget_bytes:
            return k * G, k
    for t in range(G, 0, -1):
        if G % t == 0 and (NB // t) >= target and t * per_row <= budget_bytes:
            return t, 0
    # tiny NB: relax the min-step requirement, just fit the budget
    for k in range(N, 0, -1):
        if N % k == 0 and k * G * per_row <= budget_bytes:
            return k * G, k
    for t in range(G, 0, -1):
        if G % t == 0 and t * per_row <= budget_bytes:
            return t, 0
    # TODO(synk): for extremely large HW a single row exceeds the budget; a
    # second-level HW tiling of stage 2 (accumulate instance stats over HW
    # tiles, then apply wm per tile) would be needed.
    return 1, 0


# --------------------------- stage 1: batch-whitening stats ---------------------------
def bn_stats_kernel(x_ref, mean_ref, cov_ref, *, inv_m, hw, t_hw, ragged):
    """Accumulate per-group batch statistics (uncentered form).

    x_ref:    (Nb, 1, c, t_hw) tile of x viewed as (N, G, c, HW), native dtype
    mean_ref: (1, c, 1) f32 resident accumulator -> group mean
    cov_ref:  (1, c, c) f32 resident accumulator -> group covariance
    Grid: (G, N // Nb, cdiv(HW, t_hw)); reduction over the last two axes.
    """
    n = pl.program_id(1)
    t = pl.program_id(2)
    first = jnp.logical_and(n == 0, t == 0)
    last = jnp.logical_and(n == pl.num_programs(1) - 1,
                           t == pl.num_programs(2) - 1)

    xg = x_ref[:, 0]                                           # (Nb, c, t_hw)

    if ragged:
        # Mask the out-of-bounds tail of the last HW tile (OOB reads are
        # unspecified).  Saturates to all-true on full tiles.
        lane = lax.broadcasted_iota(jnp.int32, (1, 1, t_hw), 2)
        rem = hw - t * t_hw
        xg = jnp.where(lane < rem, xg, jnp.zeros((), xg.dtype))

    @pl.when(first)
    def _():
        mean_ref[0] = jnp.zeros_like(mean_ref[0])
        cov_ref[0] = jnp.zeros_like(cov_ref[0])

    # raw first moment (f32 accumulation; no full-tile upcast copy)
    s = jnp.sum(xg, axis=2, keepdims=True, dtype=jnp.float32)  # (Nb, c, 1)
    mean_ref[0] += jnp.sum(s, axis=0)                          # (c, 1)

    # raw second moment: native-dtype MXU, f32 accumulation
    cp = lax.dot_general(xg, xg, (((2,), (2,)), ((0,), (0,))),
                         preferred_element_type=jnp.float32)   # (Nb, c, c)
    cov_ref[0] += jnp.sum(cp, axis=0)                          # (c, c)

    @pl.when(last)
    def _():
        m = mean_ref[0] * inv_m                                # (c, 1)
        mmT = lax.dot_general(m, m, (((1,), (1,)), ((), ())),
                              preferred_element_type=jnp.float32)
        cov_ref[0] = cov_ref[0] * inv_m - mmT
        mean_ref[0] = m


# --------------------------- stage 2: per-(sample, group) whitening ---------------------------
def whiten_kernel(x_ref, mbn_ref, cbn_ref, gamma_ref, beta_ref, w_ref, out_ref,
                  *, eps, T, inv_hw, tile_k, TB, G):
    """Whiten TB (sample, group) rows per grid step.

    x_ref:     (TB, c, HW)  streaming block, native dtype (aliased to out in HBM)
    mbn_ref:   (G, c, 1) f32   VMEM-resident batch means
    cbn_ref:   (G, c, c) f32   VMEM-resident batch covariances
    gamma_ref: (G, c, 1) f32   affine scale
    beta_ref:  (G, c, 1) f32   affine bias
    w_ref:     (4,)      f32   SMEM: [mean_w0, mean_w1, var_w0, var_w1]
    """
    xd = x_ref[...]                                            # (TB, c, HW) native dtype
    c = xd.shape[1]

    # batched A @ B^T and A @ B with f32 accumulation
    bmmT = lambda a, b: lax.dot_general(
        a, b, (((2,), (2,)), ((0,), (0,))), preferred_element_type=jnp.float32)
    bmm = lambda a, b: lax.dot_general(
        a, b, (((2,), (1,)), ((0,), (0,))), preferred_element_type=jnp.float32)

    # per-group parameters for the TB rows of this block
    if tile_k > 0:                                             # TB == tile_k * G
        reps = (tile_k, 1, 1)
        mean_bn = jnp.tile(mbn_ref[...], reps)                 # (TB, c, 1)
        cov_bn = jnp.tile(cbn_ref[...], reps)                  # (TB, c, c)
        gamma = jnp.tile(gamma_ref[...], reps)
        beta = jnp.tile(beta_ref[...], reps)
    else:                                                      # TB divides G
        g0 = (pl.program_id(0) * TB) % G
        mean_bn = mbn_ref[pl.ds(g0, TB)]
        cov_bn = cbn_ref[pl.ds(g0, TB)]
        gamma = gamma_ref[pl.ds(g0, TB)]
        beta = beta_ref[pl.ds(g0, TB)]

    mw0, mw1, vw0, vw1 = w_ref[0], w_ref[1], w_ref[2], w_ref[3]

    # instance statistics (uncentered second moment), native-dtype MXU, f32 acc.
    mean_in = jnp.sum(xd, axis=-1, keepdims=True,
                      dtype=jnp.float32) * inv_hw              # (TB, c, 1) f32
    # NOTE: the mean outer product stays a tiny k=1 MXU op (MXU has ample slack
    # at c=16; a VPU outer product would need a (c,1)->(1,c) relayout).
    cov_in = bmmT(xd, xd) * inv_hw - bmmT(mean_in, mean_in)    # (TB, c, c) f32

    rows = lax.broadcasted_iota(jnp.int32, (1, c, c), 1)
    cols = lax.broadcasted_iota(jnp.int32, (1, c, c), 2)
    eye = (rows == cols).astype(jnp.float32)                   # (1, c, c)

    mean = mw0 * mean_bn + mw1 * mean_in                       # (TB, c, 1)
    cov = vw0 * cov_bn + vw1 * cov_in + eps * eye              # (TB, c, c)

    # Newton-Schulz: wm ~= cov^{-1/2}  (first iteration with P0 = I folded)
    trace = jnp.sum(cov * eye, axis=(1, 2), keepdims=True)     # (TB, 1, 1)
    rTr = pl.reciprocal(trace, approx=True)                    # error cancels in wm
    cov_n = cov * rTr
    P = 1.5 * eye - 0.5 * cov_n
    for _ in range(T - 1):
        P3 = bmm(bmm(P, P), P)
        P = 1.5 * P - 0.5 * bmm(P3, cov_n)
    wm = P * jnp.sqrt(rTr)                                     # (TB, c, c) f32

    # fold mean subtraction + affine into the whitening matmul:
    #   out = (gamma*wm) @ x + (beta - (gamma*wm) @ mean)
    wm_g = wm * gamma                                          # row-scale by gamma
    b_eff = beta - bmm(wm_g, mean)                             # (TB, c, 1) f32
    out_ref[...] = (bmm(wm_g.astype(xd.dtype), xd) + b_eff).astype(out_ref.dtype)


# --------------------------- wrapper ---------------------------
def switch_whiten_2d(x, sw_mean_weight, sw_var_weight, weight, bias,
                     num_pergroup=16, eps=1e-5, T=5,
                     stage1_block_bytes=None, stage2_block_bytes=None,
                     vmem_limit_bytes=None):
    N, C, H, W = x.shape
    c = num_pergroup
    assert C % c == 0
    G = C // c
    HW = H * W
    out_dtype = x.dtype
    bpe = x.dtype.itemsize

    s1_budget, s2_budget, vmem_limit = _budgets(
        stage1_block_bytes, stage2_block_bytes, vmem_limit_bytes)

    x_r = x.reshape(N, G, c, HW)            # pure reshape: no pad, no transpose

    # ---- stage 1: per-group batch-whitening stats ----
    nb, t_hw = _stage1_tiles(N, c, HW, bpe, s1_budget)
    n_t = -(-HW // t_hw)
    ragged = (HW % t_hw) != 0
    inv_m = 1.0 / float(N * HW)

    mean_bn, cov_bn = pl.pallas_call(
        functools.partial(bn_stats_kernel, inv_m=inv_m, hw=HW, t_hw=t_hw,
                          ragged=ragged),
        out_shape=(jax.ShapeDtypeStruct((G, c, 1), jnp.float32),
                   jax.ShapeDtypeStruct((G, c, c), jnp.float32)),
        grid_spec=pltpu.PrefetchScalarGridSpec(
            num_scalar_prefetch=0, grid=(G, N // nb, n_t),
            in_specs=[pl.BlockSpec((nb, 1, c, t_hw),
                                   lambda g, n, t: (n, g, 0, t))],
            out_specs=(pl.BlockSpec((1, c, 1), lambda g, n, t: (g, 0, 0)),
                       pl.BlockSpec((1, c, c), lambda g, n, t: (g, 0, 0)))),
        compiler_params=pltpu.CompilerParams(
            dimension_semantics=("parallel", "arbitrary", "arbitrary"),
            vmem_limit_bytes=vmem_limit),
    )(x_r)

    # ---- tiny glue: softmax over switching weights, parameter reshapes ----
    mean_w = jax.nn.softmax(sw_mean_weight.astype(jnp.float32))
    var_w = jax.nn.softmax(sw_var_weight.astype(jnp.float32))
    w_vec = jnp.concatenate([mean_w, var_w], axis=0)           # (4,) -> SMEM

    gamma = weight.astype(jnp.float32).reshape(G, c, 1)
    beta = bias.astype(jnp.float32).reshape(G, c, 1)

    # ---- stage 2: batched per-(sample, group) whitening ----
    in_data = x_r.reshape(N * G, c, HW)
    NB = N * G
    TB, tile_k = _pick_tb(N, G, c, HW, bpe, s2_budget)

    kernel = functools.partial(whiten_kernel, eps=float(eps), T=int(T),
                               inv_hw=1.0 / float(HW), tile_k=tile_k,
                               TB=TB, G=G)
    # TODO(synk): optionally pipeline_mode=pl.Buffered(3) on the streaming input
    # if profiles show exposed input DMA (keep 2 on v7x's smaller VMEM).
    x_hat = pl.pallas_call(
        kernel,
        out_shape=jax.ShapeDtypeStruct((NB, c, HW), out_dtype),
        grid_spec=pltpu.PrefetchScalarGridSpec(
            num_scalar_prefetch=0, grid=(NB // TB,),
            in_specs=[
                pl.BlockSpec((TB, c, HW), lambda b: (b, 0, 0)),
                pl.BlockSpec((G, c, 1), lambda b: (0, 0, 0)),   # resident
                pl.BlockSpec((G, c, c), lambda b: (0, 0, 0)),   # resident
                pl.BlockSpec((G, c, 1), lambda b: (0, 0, 0)),   # resident
                pl.BlockSpec((G, c, 1), lambda b: (0, 0, 0)),   # resident
                pl.BlockSpec(memory_space=pltpu.MemorySpace.SMEM),
            ],
            out_specs=pl.BlockSpec((TB, c, HW), lambda b: (b, 0, 0))),
        input_output_aliases={0: 0},        # reuse the activation HBM buffer
        compiler_params=pltpu.CompilerParams(
            dimension_semantics=("parallel",),
            vmem_limit_bytes=vmem_limit),
    )(in_data, mean_bn, cov_bn, gamma, beta, w_vec)

    return x_hat.reshape(N, C, H, W)


# ----------------- pure-JAX reference (for correctness check) -----------------
def switch_whiten_ref(x, sw_mean_weight, sw_var_weight, weight, bias,
                      num_pergroup=16, eps=1e-5, T=5):
    N, C, H, W = x.shape
    c = num_pergroup
    G = C // c
    HW = H * W
    x = x.astype(jnp.float32)

    xt = jnp.transpose(x, (1, 0, 2, 3)).reshape(G, c, -1)
    mean_bn = jnp.mean(xt, -1, keepdims=True)
    xbn = xt - mean_bn
    cov_bn = jnp.einsum('gct,gdt->gcd', xbn, xbn) / (N * HW)
    mean_bn = jnp.tile(mean_bn[None], (N, 1, 1, 1)).reshape(N * G, c, 1)
    cov_bn = jnp.tile(cov_bn[None], (N, 1, 1, 1)).reshape(N * G, c, c)

    in_data = x.reshape(N * G, c, HW)
    mean_in = jnp.mean(in_data, -1, keepdims=True)
    xin = in_data - mean_in
    cov_in = jnp.einsum('bct,bdt->bcd', xin, xin) / HW

    mw = jax.nn.softmax(sw_mean_weight)
    vw = jax.nn.softmax(sw_var_weight)
    eye = jnp.eye(c, dtype=jnp.float32)[None]
    mean = mw[0] * mean_bn + mw[1] * mean_in
    cov = vw[0] * cov_bn + vw[1] * cov_in + eps * eye

    P = jnp.tile(eye, (N * G, 1, 1))
    rTr = 1.0 / jnp.sum(cov * eye, axis=(1, 2), keepdims=True)
    cov_n = cov * rTr
    for _ in range(T):
        P3 = P @ P @ P
        P = 1.5 * P - 0.5 * (P3 @ cov_n)
    wm = P * jnp.sqrt(rTr)
    x_hat = (wm @ (in_data - mean)).reshape(N, C, H, W)
    return x_hat * weight.reshape(1, C, 1, 1) + bias.reshape(1, C, 1, 1)


if __name__ == "__main__":
    key = jax.random.PRNGKey(0)
    kx, kw, kb = jax.random.split(key, 3)

    # Parameters per __init__ (sw_type=2 -> 2 components, tie_weight=False,
    # affine=True); perturbed deterministically to exercise the affine fold.
    sw_mean_weight = jnp.array([1.0, 0.5], jnp.float32)
    sw_var_weight = jnp.array([0.7, 1.3], jnp.float32)

    def check(x, num_pergroup, tol, **overrides):
        C = x.shape[1]
        weight = 1.0 + 0.1 * jax.random.normal(kw, (C,), jnp.float32)
        bias = 0.1 * jax.random.normal(kb, (C,), jnp.float32)
        fn = jax.jit(functools.partial(switch_whiten_2d,
                                       num_pergroup=num_pergroup, **overrides))
        out = jax.block_until_ready(
            fn(x, sw_mean_weight, sw_var_weight, weight, bias))
        ref = switch_whiten_ref(x.astype(jnp.float32), sw_mean_weight,
                                sw_var_weight, weight, bias,
                                num_pergroup=num_pergroup)
        assert out.shape == x.shape and out.dtype == x.dtype
        err = float(jnp.max(jnp.abs(out.astype(jnp.float32) - ref)))
        assert err < tol, f"max abs err {err} (shape {x.shape}, dtype {x.dtype})"

    # 1) f32, HW multiple of 128, two groups (dynamic group-slice stage-2 path).
    x1 = jax.random.normal(kx, (2, 32, 16, 16), dtype=jnp.float32)
    check(x1, 16, 1e-2)

    # 2) f32, HW=400 (not a multiple of 128), G=1; tiny stage-1 budget forces
    #    HW tiling with a masked ragged tail (no padding anywhere).
    x2 = jax.random.normal(kx, (2, 16, 20, 20), dtype=jnp.float32)
    check(x2, 16, 1e-2, stage1_block_bytes=16 * 1024)

    # 3) bf16 streaming path: native-dtype MXU matmuls with f32 accumulation.
    x3 = jax.random.normal(kx, (2, 32, 16, 16), dtype=jnp.float32).astype(jnp.bfloat16)
    check(x3, 16, 2e-1)

    print("KERNEL_OK")
</pallas_src>

<mosaic_0001>
module attributes {stable_mosaic.version = 11 : i64} {
  func.func @bn_stats_kernel(%arg0: i32, %arg1: i32, %arg2: i32, %arg3: memref<2x1x16x256xf32, #tpu.memory_space<vmem>>, %arg4: memref<1x16x1xf32, #tpu.memory_space<vmem>>, %arg5: memref<1x16x16xf32, #tpu.memory_space<vmem>>) attributes {dimension_semantics = [#tpu.dimension_semantics<parallel>, #tpu.dimension_semantics<arbitrary>, #tpu.dimension_semantics<arbitrary>], iteration_bounds = array<i64: 2, 1, 1>, scalar_prefetch = 0 : i64, scratch_operands = 0 : i64, tpu.core_type = #tpu.core_type<tc>, window_params = [{transform_indices = @transform_0, window_bounds = array<i64: 2, 1, 16, 256>}, {transform_indices = @transform_1, window_bounds = array<i64: 1, 16, 1>}, {transform_indices = @transform_2, window_bounds = array<i64: 1, 16, 16>}]} {
    %c0_i32 = arith.constant 0 : i32
    %0 = arith.cmpi eq, %arg1, %c0_i32 : i32
    %c0_i32_0 = arith.constant 0 : i32
    %1 = arith.cmpi eq, %arg2, %c0_i32_0 : i32
    %2 = arith.andi %0, %1 : i1
    %c0_i32_1 = arith.constant 0 : i32
    %3 = arith.cmpi eq, %arg1, %c0_i32_1 : i32
    %c0_i32_2 = arith.constant 0 : i32
    %4 = arith.cmpi eq, %arg2, %c0_i32_2 : i32
    %5 = arith.andi %3, %4 : i1
    %c0 = arith.constant 0 : index
    %c0_3 = arith.constant 0 : index
    %c0_4 = arith.constant 0 : index
    %c0_5 = arith.constant 0 : index
    %6 = vector.load %arg3[%c0, %c0_3, %c0_4, %c0_5] : memref<2x1x16x256xf32, #tpu.memory_space<vmem>>, vector<2x1x16x256xf32>
    %7 = vector.shape_cast %6 : vector<2x1x16x256xf32> to vector<2x16x256xf32>
    %8 = arith.extui %2 : i1 to i32
    %c0_i32_6 = arith.constant 0 : i32
    %9 = arith.cmpi ne, %8, %c0_i32_6 : i32
    scf.if %9 {
      %cst_23 = arith.constant 0.000000e+00 : f32
      %29 = vector.broadcast %cst_23 : f32 to vector<16x1xf32>
      %c0_24 = arith.constant 0 : index
      %c0_25 = arith.constant 0 : index
      %c0_26 = arith.constant 0 : index
      %30 = vector.load %arg4[%c0_24, %c0_25, %c0_26] : memref<1x16x1xf32, #tpu.memory_space<vmem>>, vector<1x16x1xf32>
      %31 = vector.shape_cast %30 : vector<1x16x1xf32> to vector<16x1xf32>
      %32 = vector.shape_cast %29 : vector<16x1xf32> to vector<1x16x1xf32>
      tpu.vector_store %arg4[%c0_24, %c0_25, %c0_26], %32 {strides = array<i32>} : memref<1x16x1xf32, #tpu.memory_space<vmem>>, vector<1x16x1xf32>,
      %cst_27 = arith.constant 0.000000e+00 : f32
      %33 = vector.broadcast %cst_27 : f32 to vector<16x16xf32>
      %c0_28 = arith.constant 0 : index
      %c0_29 = arith.constant 0 : index
      %c0_30 = arith.constant 0 : index
      %34 = vector.load %arg5[%c0_28, %c0_29, %c0_30] : memref<1x16x16xf32, #tpu.memory_space<vmem>>, vector<1x16x16xf32>
      %35 = vector.shape_cast %34 : vector<1x16x16xf32> to vector<16x16xf32>
      %36 = vector.shape_cast %33 : vector<16x16xf32> to vector<1x16x16xf32>
      tpu.vector_store %arg5[%c0_28, %c0_29, %c0_30], %36 {strides = array<i32>} : memref<1x16x16xf32, #tpu.memory_space<vmem>>, vector<1x16x16xf32>,
    } else {
    }
    %cst = arith.constant dense<0.000000e+00> : vector<2x16xf32>
    %10 = vector.multi_reduction <add>, %7, %cst [2] : vector<2x16x256xf32> to vector<2x16xf32>
    %11 = vector.shape_cast %10 : vector<2x16xf32> to vector<2x16x1xf32>
    %c0_7 = arith.constant 0 : index
    %c0_8 = arith.constant 0 : index
    %c0_9 = arith.constant 0 : index
    %12 = vector.load %arg4[%c0_7, %c0_8, %c0_9] : memref<1x16x1xf32, #tpu.memory_space<vmem>>, vector<1x16x1xf32>
    %13 = vector.shape_cast %12 : vector<1x16x1xf32> to vector<16x1xf32>
    %cst_10 = arith.constant dense<0.000000e+00> : vector<16x1xf32>
    %14 = vector.multi_reduction <add>, %11, %cst_10 [0] : vector<2x16x1xf32> to vector<16x1xf32>
    %15 = arith.addf %13, %14 : vector<16x1xf32>
    %c0_11 = arith.constant 0 : index
    %c0_12 = arith.constant 0 : index
    %c0_13 = arith.constant 0 : index
    %16 = vector.load %arg4[%c0_11, %c0_12, %c0_13] : memref<1x16x1xf32, #tpu.memory_space<vmem>>, vector<1x16x1xf32>
    %17 = vector.shape_cast %16 : vector<1x16x1xf32> to vector<16x1xf32>
    %18 = vector.shape_cast %15 : vector<16x1xf32> to vector<1x16x1xf32>
    tpu.vector_store %arg4[%c0_11, %c0_12, %c0_13], %18 {strides = array<i32>} : memref<1x16x1xf32, #tpu.memory_space<vmem>>, vector<1x16x1xf32>,
    %cst_14 = arith.constant dense<0.000000e+00> : vector<2x16x16xf32>
    %19 = tpu.matmul %7, %7, %cst_14 {dimension_numbers = #tpu.dot_dimension_numbers<[2], [2], [1], [1], [0, 0, 0, 1, 1, 1], [0], [0]>} : vector<2x16x256xf32>, vector<2x16x256xf32>, vector<2x16x16xf32> -> vector<2x16x16xf32>
    %c0_15 = arith.constant 0 : index
    %c0_16 = arith.constant 0 : index
    %c0_17 = arith.constant 0 : index
    %20 = vector.load %arg5[%c0_15, %c0_16, %c0_17] : memref<1x16x16xf32, #tpu.memory_space<vmem>>, vector<1x16x16xf32>
    %21 = vector.shape_cast %20 : vector<1x16x16xf32> to vector<16x16xf32>
    %cst_18 = arith.constant dense<0.000000e+00> : vector<16x16xf32>
    %22 = vector.multi_reduction <add>, %19, %cst_18 [0] : vector<2x16x16xf32> to vector<16x16xf32>
    %23 = arith.addf %21, %22 : vector<16x16xf32>
    %c0_19 = arith.constant 0 : index
    %c0_20 = arith.constant 0 : index
    %c0_21 = arith.constant 0 : index
    %24 = vector.load %arg5[%c0_19, %c0_20, %c0_21] : memref<1x16x16xf32, #tpu.memory_space<vmem>>, vector<1x16x16xf32>
    %25 = vector.shape_cast %24 : vector<1x16x16xf32> to vector<16x16xf32>
    %26 = vector.shape_cast %23 : vector<16x16xf32> to vector<1x16x16xf32>
    tpu.vector_store %arg5[%c0_19, %c0_20, %c0_21], %26 {strides = array<i32>} : memref<1x16x16xf32, #tpu.memory_space<vmem>>, vector<1x16x16xf32>,
    %27 = arith.extui %5 : i1 to i32
    %c0_i32_22 = arith.constant 0 : i32
    %28 = arith.cmpi ne, %27, %c0_i32_22 : i32
    scf.if %28 {
      %c0_23 = arith.constant 0 : index
      %c0_24 = arith.constant 0 : index
      %c0_25 = arith.constant 0 : index
      %29 = vector.load %arg4[%c0_23, %c0_24, %c0_25] : memref<1x16x1xf32, #tpu.memory_space<vmem>>, vector<1x16x1xf32>
      %30 = vector.shape_cast %29 : vector<1x16x1xf32> to vector<16x1xf32>
      %cst_26 = arith.constant 0.001953125 : f32
      %31 = vector.broadcast %cst_26 : f32 to vector<16x1xf32>
      %32 = arith.mulf %30, %31 : vector<16x1xf32>
      %cst_27 = arith.constant dense<0.000000e+00> : vector<16x16xf32>
      %33 = tpu.matmul %32, %32, %cst_27 {dimension_numbers = #tpu.dot_dimension_numbers<[1], [1], [0], [0], [0, 0, 1, 0], [], []>} : vector<16x1xf32>, vector<16x1xf32>, vector<16x16xf32> -> vector<16x16xf32>
      %c0_28 = arith.constant 0 : index
      %c0_29 = arith.constant 0 : index
      %c0_30 = arith.constant 0 : index
      %34 = vector.load %arg5[%c0_28, %c0_29, %c0_30] : memref<1x16x16xf32, #tpu.memory_space<vmem>>, vector<1x16x16xf32>
      %35 = vector.shape_cast %34 : vector<1x16x16xf32> to vector<16x16xf32>
      %cst_31 = arith.constant 0.001953125 : f32
      %36 = vector.broadcast %cst_31 : f32 to vector<16x16xf32>
      %37 = arith.mulf %35, %36 : vector<16x16xf32>
      %38 = arith.subf %37, %33 : vector<16x16xf32>
      %c0_32 = arith.constant 0 : index
      %c0_33 = arith.constant 0 : index
      %c0_34 = arith.constant 0 : index
      %39 = vector.load %arg5[%c0_32, %c0_33, %c0_34] : memref<1x16x16xf32, #tpu.memory_space<vmem>>, vector<1x16x16xf32>
      %40 = vector.shape_cast %39 : vector<1x16x16xf32> to vector<16x16xf32>
      %41 = vector.shape_cast %38 : vector<16x16xf32> to vector<1x16x16xf32>
      tpu.vector_store %arg5[%c0_32, %c0_33, %c0_34], %41 {strides = array<i32>} : memref<1x16x16xf32, #tpu.memory_space<vmem>>, vector<1x16x16xf32>,
      %c0_35 = arith.constant 0 : index
      %c0_36 = arith.constant 0 : index
      %c0_37 = arith.constant 0 : index
      %42 = vector.load %arg4[%c0_35, %c0_36, %c0_37] : memref<1x16x1xf32, #tpu.memory_space<vmem>>, vector<1x16x1xf32>
      %43 = vector.shape_cast %42 : vector<1x16x1xf32> to vector<16x1xf32>
      %44 = vector.shape_cast %32 : vector<16x1xf32> to vector<1x16x1xf32>
      tpu.vector_store %arg4[%c0_35, %c0_36, %c0_37], %44 {strides = array<i32>} : memref<1x16x1xf32, #tpu.memory_space<vmem>>, vector<1x16x1xf32>,
    } else {
    }
    return
  }
  func.func @transform_0(%arg0: i32, %arg1: i32, %arg2: i32) -> (i32, i32, i32, i32) {
    %c0_i32 = arith.constant 0 : i32
    %c0_i32_0 = arith.constant 0 : i32
    return %arg1, %arg0, %c0_i32, %arg2 : i32, i32, i32, i32
  }
  func.func @transform_1(%arg0: i32, %arg1: i32, %arg2: i32) -> (i32, i32, i32) {
    %c0_i32 = arith.constant 0 : i32
    %c0_i32_0 = arith.constant 0 : i32
    %c0_i32_1 = arith.constant 0 : i32
    return %arg0, %c0_i32, %c0_i32_0 : i32, i32, i32
  }
  func.func @transform_2(%arg0: i32, %arg1: i32, %arg2: i32) -> (i32, i32, i32) {
    %c0_i32 = arith.constant 0 : i32
    %c0_i32_0 = arith.constant 0 : i32
    %c0_i32_1 = arith.constant 0 : i32
    return %arg0, %c0_i32, %c0_i32_0 : i32, i32, i32
  }
}

module attributes {stable_mosaic.version = 11 : i64} {
  func.func @whiten_kernel(%arg0: i32, %arg1: memref<1x16x256xf32, #tpu.memory_space<vmem>>, %arg2: memref<2x16x1xf32, #tpu.memory_space<vmem>>, %arg3: memref<2x16x16xf32, #tpu.memory_space<vmem>>, %arg4: memref<2x16x1xf32, #tpu.memory_space<vmem>>, %arg5: memref<2x16x1xf32, #tpu.memory_space<vmem>>, %arg6: memref<4xf32, #tpu.memory_space<smem>>, %arg7: memref<1x16x256xf32, #tpu.memory_space<vmem>>) attributes {dimension_semantics = [#tpu.dimension_semantics<parallel>], iteration_bounds = array<i64: 4>, scalar_prefetch = 0 : i64, scratch_operands = 0 : i64, tpu.core_type = #tpu.core_type<tc>, window_params = [{transform_indices = @transform_0, window_bounds = array<i64: 1, 16, 256>}, {pipeline_mode = #tpu.pipeline_mode<synchronous>, transform_indices = @transform_1, window_bounds = array<i64: 2, 16, 1>}, {pipeline_mode = #tpu.pipeline_mode<synchronous>, transform_indices = @transform_2, window_bounds = array<i64: 2, 16, 16>}, {pipeline_mode = #tpu.pipeline_mode<synchronous>, transform_indices = @transform_3, window_bounds = array<i64: 2, 16, 1>}, {pipeline_mode = #tpu.pipeline_mode<synchronous>, transform_indices = @transform_4, window_bounds = array<i64: 2, 16, 1>}, {transform_indices = @transform_5, window_bounds = array<i64: 4>}, {transform_indices = @transform_6, window_bounds = array<i64: 1, 16, 256>}]} {
    %c0 = arith.constant 0 : index
    %c0_0 = arith.constant 0 : index
    %c0_1 = arith.constant 0 : index
    %0 = vector.load %arg1[%c0, %c0_0, %c0_1] : memref<1x16x256xf32, #tpu.memory_space<vmem>>, vector<1x16x256xf32>
    %c1_i32 = arith.constant 1 : i32
    %1 = arith.muli %arg0, %c1_i32 : i32
    %c2_i32 = arith.constant 2 : i32
    %c0_i32 = arith.constant 0 : i32
    %2 = arith.cmpi eq, %c2_i32, %c0_i32 : i32
    %c1_i32_2 = arith.constant 1 : i32
    %3 = arith.select %2, %c1_i32_2, %c2_i32 : i32
    %4 = arith.remsi %1, %3 : i32
    %c0_i32_3 = arith.constant 0 : i32
    %5 = arith.cmpi ne, %4, %c0_i32_3 : i32
    %c0_i32_4 = arith.constant 0 : i32
    %6 = arith.cmpi slt, %4, %c0_i32_4 : i32
    %c0_i32_5 = arith.constant 0 : i32
    %7 = arith.cmpi slt, %3, %c0_i32_5 : i32
    %8 = arith.xori %6, %7 : i1
    %9 = arith.andi %8, %5 : i1
    %10 = arith.addi %4, %3 : i32
    %11 = arith.select %9, %10, %4 : i32
    %12 = arith.index_cast %11 : i32 to index
    %c0_6 = arith.constant 0 : index
    %c0_7 = arith.constant 0 : index
    %13 = vector.load %arg2[%12, %c0_6, %c0_7] : memref<2x16x1xf32, #tpu.memory_space<vmem>>, vector<1x16x1xf32>
    %14 = arith.index_cast %11 : i32 to index
    %c0_8 = arith.constant 0 : index
    %c0_9 = arith.constant 0 : index
    %15 = vector.load %arg3[%14, %c0_8, %c0_9] : memref<2x16x16xf32, #tpu.memory_space<vmem>>, vector<1x16x16xf32>
    %16 = arith.index_cast %11 : i32 to index
    %c0_10 = arith.constant 0 : index
    %c0_11 = arith.constant 0 : index
    %17 = vector.load %arg4[%16, %c0_10, %c0_11] : memref<2x16x1xf32, #tpu.memory_space<vmem>>, vector<1x16x1xf32>
    %18 = arith.index_cast %11 : i32 to index
    %c0_12 = arith.constant 0 : index
    %c0_13 = arith.constant 0 : index
    %19 = vector.load %arg5[%18, %c0_12, %c0_13] : memref<2x16x1xf32, #tpu.memory_space<vmem>>, vector<1x16x1xf32>
    %c0_14 = arith.constant 0 : index
    %20 = memref.load %arg6[%c0_14] : memref<4xf32, #tpu.memory_space<smem>>
    %c1 = arith.constant 1 : index
    %21 = memref.load %arg6[%c1] : memref<4xf32, #tpu.memory_space<smem>>
    %c2 = arith.constant 2 : index
    %22 = memref.load %arg6[%c2] : memref<4xf32, #tpu.memory_space<smem>>
    %c3 = arith.constant 3 : index
    %23 = memref.load %arg6[%c3] : memref<4xf32, #tpu.memory_space<smem>>
    %cst = arith.constant dense<0.000000e+00> : vector<1x16xf32>
    %24 = vector.multi_reduction <add>, %0, %cst [2] : vector<1x16x256xf32> to vector<1x16xf32>
    %25 = vector.shape_cast %24 : vector<1x16xf32> to vector<1x16x1xf32>
    %cst_15 = arith.constant 3.906250e-03 : f32
    %26 = vector.broadcast %cst_15 : f32 to vector<1x16x1xf32>
    %27 = arith.mulf %25, %26 : vector<1x16x1xf32>
    %cst_16 = arith.constant dense<0.000000e+00> : vector<1x16x16xf32>
    %28 = tpu.matmul %0, %0, %cst_16 {dimension_numbers = #tpu.dot_dimension_numbers<[2], [2], [1], [1], [0, 0, 0, 1, 1, 1], [0], [0]>} : vector<1x16x256xf32>, vector<1x16x256xf32>, vector<1x16x16xf32> -> vector<1x16x16xf32>
    %cst_17 = arith.constant 3.906250e-03 : f32
    %29 = vector.broadcast %cst_17 : f32 to vector<1x16x16xf32>
    %30 = arith.mulf %28, %29 : vector<1x16x16xf32>
    %cst_18 = arith.constant dense<0.000000e+00> : vector<1x16x16xf32>
    %31 = tpu.matmul %27, %27, %cst_18 {dimension_numbers = #tpu.dot_dimension_numbers<[2], [2], [1], [1], [0, 0, 0, 1, 1, 1], [0], [0]>} : vector<1x16x1xf32>, vector<1x16x1xf32>, vector<1x16x16xf32> -> vector<1x16x16xf32>
    %32 = arith.subf %30, %31 : vector<1x16x16xf32>
    %33 = tpu.iota {dimensions = array<i32: 1>} : vector<1x16x16xi32>
    %34 = tpu.iota {dimensions = array<i32: 2>} : vector<1x16x16xi32>
    %35 = arith.cmpi eq, %33, %34 : vector<1x16x16xi32>
    %36 = arith.extui %35 : vector<1x16x16xi1> to vector<1x16x16xi32>
    %37 = arith.sitofp %36 : vector<1x16x16xi32> to vector<1x16x16xf32>
    %38 = vector.broadcast %20 : f32 to vector<1x16x1xf32>
    %39 = arith.mulf %38, %13 : vector<1x16x1xf32>
    %40 = vector.broadcast %21 : f32 to vector<1x16x1xf32>
    %41 = arith.mulf %40, %27 : vector<1x16x1xf32>
    %42 = arith.addf %39, %41 : vector<1x16x1xf32>
    %43 = vector.broadcast %22 : f32 to vector<1x16x16xf32>
    %44 = arith.mulf %43, %15 : vector<1x16x16xf32>
    %45 = vector.broadcast %23 : f32 to vector<1x16x16xf32>
    %46 = arith.mulf %45, %32 : vector<1x16x16xf32>
    %47 = arith.addf %44, %46 : vector<1x16x16xf32>
    %cst_19 = arith.constant 9.99999974E-6 : f32
    %48 = vector.broadcast %cst_19 : f32 to vector<1x16x16xf32>
    %49 = arith.mulf %48, %37 : vector<1x16x16xf32>
    %50 = arith.addf %47, %49 : vector<1x16x16xf32>
    %51 = arith.mulf %50, %37 : vector<1x16x16xf32>
    %cst_20 = arith.constant dense<0.000000e+00> : vector<1xf32>
    %52 = vector.multi_reduction <add>, %51, %cst_20 [1, 2] : vector<1x16x16xf32> to vector<1xf32>
    %53 = vector.shape_cast %52 : vector<1xf32> to vector<1x1x1xf32>
    %54 = tpu.reciprocal %53 {approx = true} : vector<1x1x1xf32> -> vector<1x1x1xf32>
    %55 = vector.broadcast %54 : vector<1x1x1xf32> to vector<1x16x16xf32>
    %56 = arith.mulf %50, %55 : vector<1x16x16xf32>
    %cst_21 = arith.constant 1.500000e+00 : f32
    %57 = vector.broadcast %cst_21 : f32 to vector<1x16x16xf32>
    %58 = arith.mulf %57, %37 : vector<1x16x16xf32>
    %cst_22 = arith.constant 5.000000e-01 : f32
    %59 = vector.broadcast %cst_22 : f32 to vector<1x16x16xf32>
    %60 = arith.mulf %59, %56 : vector<1x16x16xf32>
    %61 = arith.subf %58, %60 : vector<1x16x16xf32>
    %cst_23 = arith.constant dense<0.000000e+00> : vector<1x16x16xf32>
    %62 = tpu.matmul %61, %61, %cst_23 {dimension_numbers = #tpu.dot_dimension_numbers<[2], [1], [1], [2], [0, 0, 0, 1, 1, 2], [0], [0]>} : vector<1x16x16xf32>, vector<1x16x16xf32>, vector<1x16x16xf32> -> vector<1x16x16xf32>
    %cst_24 = arith.constant dense<0.000000e+00> : vector<1x16x16xf32>
    %63 = tpu.matmul %62, %61, %cst_24 {dimension_numbers = #tpu.dot_dimension_numbers<[2], [1], [1], [2], [0, 0, 0, 1, 1, 2], [0], [0]>} : vector<1x16x16xf32>, vector<1x16x16xf32>, vector<1x16x16xf32> -> vector<1x16x16xf32>
    %cst_25 = arith.constant 1.500000e+00 : f32
    %64 = vector.broadcast %cst_25 : f32 to vector<1x16x16xf32>
    %65 = arith.mulf %64, %61 : vector<1x16x16xf32>
    %cst_26 = arith.constant dense<0.000000e+00> : vector<1x16x16xf32>
    %66 = tpu.matmul %63, %56, %cst_26 {dimension_numbers = #tpu.dot_dimension_numbers<[2], [1], [1], [2], [0, 0, 0, 1, 1, 2], [0], [0]>} : vector<1x16x16xf32>, vector<1x16x16xf32>, vector<1x16x16xf32> -> vector<1x16x16xf32>
    %cst_27 = arith.constant 5.000000e-01 : f32
    %67 = vector.broadcast %cst_27 : f32 to vector<1x16x16xf32>
    %68 = arith.mulf %67, %66 : vector<1x16x16xf32>
    %69 = arith.subf %65, %68 : vector<1x16x16xf32>
    %cst_28 = arith.constant dense<0.000000e+00> : vector<1x16x16xf32>
    %70 = tpu.matmul %69, %69, %cst_28 {dimension_numbers = #tpu.dot_dimension_numbers<[2], [1], [1], [2], [0, 0, 0, 1, 1, 2], [0], [0]>} : vector<1x16x16xf32>, vector<1x16x16xf32>, vector<1x16x16xf32> -> vector<1x16x16xf32>
    %cst_29 = arith.constant dense<0.000000e+00> : vector<1x16x16xf32>
    %71 = tpu.matmul %70, %69, %cst_29 {dimension_numbers = #tpu.dot_dimension_numbers<[2], [1], [1], [2], [0, 0, 0, 1, 1, 2], [0], [0]>} : vector<1x16x16xf32>, vector<1x16x16xf32>, vector<1x16x16xf32> -> vector<1x16x16xf32>
    %cst_30 = arith.constant 1.500000e+00 : f32
    %72 = vector.broadcast %cst_30 : f32 to vector<1x16x16xf32>
    %73 = arith.mulf %72, %69 : vector<1x16x16xf32>
    %cst_31 = arith.constant dense<0.000000e+00> : vector<1x16x16xf32>
    %74 = tpu.matmul %71, %56, %cst_31 {dimension_numbers = #tpu.dot_dimension_numbers<[2], [1], [1], [2], [0, 0, 0, 1, 1, 2], [0], [0]>} : vector<1x16x16xf32>, vector<1x16x16xf32>, vector<1x16x16xf32> -> vector<1x16x16xf32>
    %cst_32 = arith.constant 5.000000e-01 : f32
    %75 = vector.broadcast %cst_32 : f32 to vector<1x16x16xf32>
    %76 = arith.mulf %75, %74 : vector<1x16x16xf32>
    %77 = arith.subf %73, %76 : vector<1x16x16xf32>
    %cst_33 = arith.constant dense<0.000000e+00> : vector<1x16x16xf32>
    %78 = tpu.matmul %77, %77, %cst_33 {dimension_numbers = #tpu.dot_dimension_numbers<[2], [1], [1], [2], [0, 0, 0, 1, 1, 2], [0], [0]>} : vector<1x16x16xf32>, vector<1x16x16xf32>, vector<1x16x16xf32> -> vector<1x16x16xf32>
    %cst_34 = arith.constant dense<0.000000e+00> : vector<1x16x16xf32>
    %79 = tpu.matmul %78, %77, %cst_34 {dimension_numbers = #tpu.dot_dimension_numbers<[2], [1], [1], [2], [0, 0, 0, 1, 1, 2], [0], [0]>} : vector<1x16x16xf32>, vector<1x16x16xf32>, vector<1x16x16xf32> -> vector<1x16x16xf32>
    %cst_35 = arith.constant 1.500000e+00 : f32
    %80 = vector.broadcast %cst_35 : f32 to vector<1x16x16xf32>
    %81 = arith.mulf %80, %77 : vector<1x16x16xf32>
    %cst_36 = arith.constant dense<0.000000e+00> : vector<1x16x16xf32>
    %82 = tpu.matmul %79, %56, %cst_36 {dimension_numbers = #tpu.dot_dimension_numbers<[2], [1], [1], [2], [0, 0, 0, 1, 1, 2], [0], [0]>} : vector<1x16x16xf32>, vector<1x16x16xf32>, vector<1x16x16xf32> -> vector<1x16x16xf32>
    %cst_37 = arith.constant 5.000000e-01 : f32
    %83 = vector.broadcast %cst_37 : f32 to vector<1x16x16xf32>
    %84 = arith.mulf %83, %82 : vector<1x16x16xf32>
    %85 = arith.subf %81, %84 : vector<1x16x16xf32>
    %cst_38 = arith.constant dense<0.000000e+00> : vector<1x16x16xf32>
    %86 = tpu.matmul %85, %85, %cst_38 {dimension_numbers = #tpu.dot_dimension_numbers<[2], [1], [1], [2], [0, 0, 0, 1, 1, 2], [0], [0]>} : vector<1x16x16xf32>, vector<1x16x16xf32>, vector<1x16x16xf32> -> vector<1x16x16xf32>
    %cst_39 = arith.constant dense<0.000000e+00> : vector<1x16x16xf32>
    %87 = tpu.matmul %86, %85, %cst_39 {dimension_numbers = #tpu.dot_dimension_numbers<[2], [1], [1], [2], [0, 0, 0, 1, 1, 2], [0], [0]>} : vector<1x16x16xf32>, vector<1x16x16xf32>, vector<1x16x16xf32> -> vector<1x16x16xf32>
    %cst_40 = arith.constant 1.500000e+00 : f32
    %88 = vector.broadcast %cst_40 : f32 to vector<1x16x16xf32>
    %89 = arith.mulf %88, %85 : vector<1x16x16xf32>
    %cst_41 = arith.constant dense<0.000000e+00> : vector<1x16x16xf32>
    %90 = tpu.matmul %87, %56, %cst_41 {dimension_numbers = #tpu.dot_dimension_numbers<[2], [1], [1], [2], [0, 0, 0, 1, 1, 2], [0], [0]>} : vector<1x16x16xf32>, vector<1x16x16xf32>, vector<1x16x16xf32> -> vector<1x16x16xf32>
    %cst_42 = arith.constant 5.000000e-01 : f32
    %91 = vector.broadcast %cst_42 : f32 to vector<1x16x16xf32>
    %92 = arith.mulf %91, %90 : vector<1x16x16xf32>
    %93 = arith.subf %89, %92 : vector<1x16x16xf32>
    %94 = math.sqrt %54 : vector<1x1x1xf32>
    %95 = vector.broadcast %94 : vector<1x1x1xf32> to vector<1x16x16xf32>
    %96 = arith.mulf %93, %95 : vector<1x16x16xf32>
    %97 = vector.broadcast %17 : vector<1x16x1xf32> to vector<1x16x16xf32>
    %98 = arith.mulf %96, %97 : vector<1x16x16xf32>
    %cst_43 = arith.constant dense<0.000000e+00> : vector<1x16x1xf32>
    %99 = tpu.matmul %98, %42, %cst_43 {dimension_numbers = #tpu.dot_dimension_numbers<[2], [1], [1], [2], [0, 0, 0, 1, 1, 2], [0], [0]>} : vector<1x16x16xf32>, vector<1x16x1xf32>, vector<1x16x1xf32> -> vector<1x16x1xf32>
    %100 = arith.subf %19, %99 : vector<1x16x1xf32>
    %cst_44 = arith.constant dense<0.000000e+00> : vector<1x16x256xf32>
    %101 = tpu.matmul %98, %0, %cst_44 {dimension_numbers = #tpu.dot_dimension_numbers<[2], [1], [1], [2], [0, 0, 0, 1, 1, 2], [0], [0]>} : vector<1x16x16xf32>, vector<1x16x256xf32>, vector<1x16x256xf32> -> vector<1x16x256xf32>
    %102 = vector.broadcast %100 : vector<1x16x1xf32> to vector<1x16x256xf32>
    %103 = arith.addf %101, %102 : vector<1x16x256xf32>
    %c0_45 = arith.constant 0 : index
    %c0_46 = arith.constant 0 : index
    %c0_47 = arith.constant 0 : index
    %104 = vector.load %arg7[%c0_45, %c0_46, %c0_47] : memref<1x16x256xf32, #tpu.memory_space<vmem>>, vector<1x16x256xf32>
    tpu.vector_store %arg7[%c0_45, %c0_46, %c0_47], %103 {strides = array<i32>} : memref<1x16x256xf32, #tpu.memory_space<vmem>>, vector<1x16x256xf32>,
    return
  }
  func.func @transform_0(%arg0: i32) -> (i32, i32, i32) {
    %c0_i32 = arith.constant 0 : i32
    %c0_i32_0 = arith.constant 0 : i32
    %c0_i32_1 = arith.constant 0 : i32
    return %arg0, %c0_i32, %c0_i32_0 : i32, i32, i32
  }
  func.func @transform_1(%arg0: i32) -> (i32, i32, i32) {
    %c0_i32 = arith.constant 0 : i32
    %c0_i32_0 = arith.constant 0 : i32
    %c0_i32_1 = arith.constant 0 : i32
    %c0_i32_2 = arith.constant 0 : i32
    return %c0_i32, %c0_i32_0, %c0_i32_1 : i32, i32, i32
  }
  func.func @transform_2(%arg0: i32) -> (i32, i32, i32) {
    %c0_i32 = arith.constant 0 : i32
    %c0_i32_0 = arith.constant 0 : i32
    %c0_i32_1 = arith.constant 0 : i32
    %c0_i32_2 = arith.constant 0 : i32
    return %c0_i32, %c0_i32_0, %c0_i32_1 : i32, i32, i32
  }
  func.func @transform_3(%arg0: i32) -> (i32, i32, i32) {
    %c0_i32 = arith.constant 0 : i32
    %c0_i32_0 = arith.constant 0 : i32
    %c0_i32_1 = arith.constant 0 : i32
    %c0_i32_2 = arith.constant 0 : i32
    return %c0_i32, %c0_i32_0, %c0_i32_1 : i32, i32, i32
  }
  func.func @transform_4(%arg0: i32) -> (i32, i32, i32) {
    %c0_i32 = arith.constant 0 : i32
    %c0_i32_0 = arith.constant 0 : i32
    %c0_i32_1 = arith.constant 0 : i32
    %c0_i32_2 = arith.constant 0 : i32
    return %c0_i32, %c0_i32_0, %c0_i32_1 : i32, i32, i32
  }
  func.func @transform_5(%arg0: i32) -> i32 {
    %c0_i32 = arith.constant 0 : i32
    %c0_i32_0 = arith.constant 0 : i32
    return %c0_i32 : i32
  }
  func.func @transform_6(%arg0: i32) -> (i32, i32, i32) {
    %c0_i32 = arith.constant 0 : i32
    %c0_i32_0 = arith.constant 0 : i32
    %c0_i32_1 = arith.constant 0 : i32
    return %arg0, %c0_i32, %c0_i32_0 : i32, i32, i32
  }
}

</mosaic_0001>

<bundles_post_ra>
// kernel: switch_whiten_2d.2
= control target key start
LH: loop header
LB: loop body
LE: loop exit
PB: predicated region body
PF: predicated region fallthrough
CT: control target
= control target key end

     0   :  { %s643_s9 = smov 0   ;;  %s645_s10 = smov 0   ;;  %s756_s0 = inlined_call_operand.vmem [shape: f32[2,2,16,256], index: 0, kind: input, shape index: {}]   ;;  %s757_s1 = inlined_call_operand.vmem [shape: f32[2,16,1], index: 1, kind: output, shape index: {0}]   ;;  %s758_s2 = inlined_call_operand.vmem [shape: f32[2,16,16], index: 2, kind: output, shape index: {1}]  }
   0x1   :  { %s647_s11 = smov 0   ;;  %s649_s12 = smov 0  }
   0x2   :  { %s651_s13 = smov 0  }
   0x3 LB: > { %s32_s14 = sadd.s32 1, %s621_s12  ;;  %p50_p1 = scmp.ne.s32.totalorder %s613_s10, %s609_s9  ;;  %s625_s13 = sphi %s651_s13, %s13_s13   ;;  %s621_s12 = sphi %s649_s12, %s762_s12   ;;  %s617_s11 = sphi %s647_s11, %s761_s11   ;;  %s613_s10 = sphi %s645_s10, %s760_s10   ;;  %s609_s9 = sphi %s643_s9, %s759_s9  }
   0x4   : > { %p34_p0 = scmp.ge.s32.totalorder %s32_s14, 2  ;;  %p51_p2 = scmp.eq.s32.totalorder %s625_s13, 0 }
   0x5   : > { %s43_s16 = sadd.s32 1, %s613_s10  ;;  %p525_p5 = scmp.ge.s32.totalorder %s625_s13, 2 }
   0x6   : > { %s764_s14 = smov (%p34_p0, %s32_s14), 0  ;;  %p52_p3 = por %p51_p2, %p50_p1 }
   0x7   : > { %s37_s15 = ssub.s32 %s621_s12, %s764_s14  ;;  %128 = sbr.rel (%p525_p5) target bundleno = 24 (0x18), region = 16 }
   0x8   : > { %p41_p4 = scmp.eq.s32.totalorder %s37_s15, 0 }
   0xa   : > { %s678_s17 = scalar_select %p41_p4, %s613_s10, %s43_s16  }
   0xc   : > { %131 = sbr.rel (!%p52_p3) target bundleno = 24 (0x18), region = 20  ;;  %s133_s18 = sand.u32 (%p52_p3), 1, %s613_s10  }
   0xd   : > { %s541_s19 = sshll.u32 (%p52_p3), %s621_s12, 5  ;;  %s526_s20 = sshll.u32 (%p52_p3), %s133_s18, 6 }
   0xe   : > { %s143_s23 = scalar_lea.vmem (%p52_p3), %s756_s0, %s541_s19  ;;  %s135_s24 = scalar_lea.vmem (%p52_p3), [#allocation2], %s526_s20 }
   0xf   : > { %v156_v0 = vld [vmem:[%s143_s23] sm:$0xff] (%p52_p3)  ;;  %v158_v1 = vld [vmem:[%s143_s23 + $0x8] sm:$0xff] (%p52_p3)  ;;  %v160_v2 = vld [vmem:[%s143_s23 + $0x10] sm:$0xff] (%p52_p3) }
  0x10   : > { %157 = vst [vmem:[%s135_s24] sm:$0xff] (%p52_p3), %v156_v0  ;;  %v162_v3 = vld [vmem:[%s143_s23 + $0x18] sm:$0xff] (%p52_p3)  ;;  %v164_v4 = vld [vmem:[%s143_s23 + $0x40] sm:$0xff] (%p52_p3)  ;;  %v166_v5 = vld [vmem:[%s143_s23 + $0x48] sm:$0xff] (%p52_p3) }
  0x11   : > { %159 = vst [vmem:[%s135_s24 + $0x8] sm:$0xff] %v158_v1  ;;  %v168_v6 = vld [vmem:[%s143_s23 + $0x50] sm:$0xff]  ;;  %v170_v7 = vld [vmem:[%s143_s23 + $0x58] sm:$0xff] }
  0x12   : > { %161 = vst [vmem:[%s135_s24 + $0x10] sm:$0xff] %v160_v2 }
  0x13   : > { %163 = vst [vmem:[%s135_s24 + $0x18] sm:$0xff] %v162_v3 }
  0x14   : > { %165 = vst [vmem:[%s135_s24 + $0x20] sm:$0xff] %v164_v4 }
  0x15   : > { %167 = vst [vmem:[%s135_s24 + $0x28] sm:$0xff] %v166_v5 }
  0x16   : > { %169 = vst [vmem:[%s135_s24 + $0x30] sm:$0xff] %v168_v6 }
  0x17   : > { %171 = vst [vmem:[%s135_s24 + $0x38] sm:$0xff] %v170_v7 }
  0x18 PF: > { %p529_p6 = scmp.ge.s32.totalorder %s625_s13, 1  ;;  %p176_p7 = scmp.lt.s32.totalorder %s625_s13, 3 }
  0x1a   : > { %p177_p8 = pnand %p529_p6, %p176_p7 }
  0x1b   : > { %s183_s25 = sand.u32 (!%p177_p8), 1, %s609_s9   ;;  %p211_p9 = scmp.lt.s32.totalorder (!%p177_p8), %s617_s11, 1 }
  0x1c   : > { %180 = sbr.rel (%p177_p8) target bundleno = 318 (0x13e), region = 43  ;;  %s530_s26 = sshll.u32 (!%p177_p8), %s183_s25, 6 }
  0x1d   : > { %s185_s27 = scalar_lea.vmem (!%p177_p8), [#allocation2], %s530_s26 }
  0x21   : > { %v227_v8 = vld [vmem:[%s185_s27 + $0x10] sm:$0xff]  ;;  %v228_v9 = vld [vmem:[%s185_s27 + $0x18] sm:$0xff]  ;;  %v225_v10 = vld [vmem:[%s185_s27] sm:$0xff]  ;;  %s766_s11 = smov (!%p211_p9, %s617_s11), 1  ;;  %vm235_vm0 = vcmask 7168   ;;  %v627_v20 = vmov 0.0  }
  0x22   : > { %v244_v11 = vadd.f32 %v228_v9, %v227_v8  ;;  %v226_v12 = vld [vmem:[%s185_s27 + $0x8] sm:$0xff]  ;;  %v231_v13 = vld [vmem:[%s185_s27 + $0x30] sm:$0xff]  ;;  %v232_v14 = vld [vmem:[%s185_s27 + $0x38] sm:$0xff]  ;;  %544 = vmatpush.xpose.msra.mxu1 %v227_v8  ;;  %276 = vmatpush.xpose.msra.mxu0 %v227_v8  ;;  %s542_s28 = sshll.u32 %s766_s11, 4  ;;  %vm238_vm1 = vcmask 130048  }
  0x23   : > { %v241_v15 = vadd.f32 %v226_v12, %v225_v10  ;;  %322 = vmatpush.xpose.msra.mxu2 %v231_v13  ;;  %345 = vmatpush.xpose.msra.mxu3 %v232_v14  ;;  %v229_v16 = vld [vmem:[%s185_s27 + $0x20] sm:$0xff]  ;;  %v230_v17 = vld [vmem:[%s185_s27 + $0x28] sm:$0xff]  ;;  %v250_v18 = vadd.f32 %v232_v14, %v231_v13  ;;  %s694_s3 = scalar_lea.vmem %s757_s1, %s542_s28  ;;  %s703_s6 = scalar_lea.vmem %s758_s2, %s542_s28 }
  0x24   : > { %245 = vadd.xlane.f32.xlu0 %v244_v11  ;;  %v247_v19 = vadd.f32 %v230_v17, %v229_v16  ;;  %237 = vst.msk [vmem:[%s694_s3 + $0x8] sm:$0xff] %vm235_vm0, %v627_v20 }
  0x25   : > { %242 = vadd.xlane.f32.xlu1 %v241_v15  ;;  %236 = vst.msk [vmem:[%s694_s3] sm:$0xff] %vm235_vm0, %v627_v20 }
  0x26   : > { %545 = vmatpush.xpose.msra.mxu1 %v225_v10  ;;  %277 = vmatpush.xpose.msra.mxu0 %v225_v10  ;;  %240 = vst.msk [vmem:[%s703_s6 + $0x8] sm:$0xff] %vm238_vm1, %v627_v20 }
  0x27   : > { %323 = vmatpush.xpose.msra.mxu2 %v229_v16  ;;  %346 = vmatpush.xpose.msra.mxu3 %v230_v17  ;;  %239 = vst.msk [vmem:[%s703_s6] sm:$0xff] %vm238_vm1, %v627_v20 }
  0x29   : > { %281 = vmatmul.f32.vlgmr.msra.gmra.mxu1 %v227_v8  ;;  %278 = vmatmul.f32.vlgmr.msra.gmra.mxu0 %v225_v10 }
  0x2a   : > { %299 = vmatpush.xpose.msrb.mxu1 %v228_v9  ;;  %324 = vmatmul.f32.vlgmr.msra.gmra.mxu2 %v229_v16 }
  0x2b   : > { %347 = vmatmul.f32.vlgmr.msra.gmra.mxu3 %v230_v17  ;;  %v254_v23 = vld [vmem:[%s694_s3 + $0x8] sm:$0xff] }
  0x2c   : > { %251 = vadd.xlane.f32.xlu0 %v250_v18  ;;  %v253_v26 = vld [vmem:[%s694_s3] sm:$0xff] }
  0x2d   : > { %248 = vadd.xlane.f32.xlu1 %v247_v19  ;;  %v355_v54 = vld [vmem:[%s703_s6 + $0x8] sm:$0xff] }
  0x2e   : > { %300 = vmatpush.xpose.msrb.mxu1 %v226_v12  ;;  %v354_v43 = vld [vmem:[%s703_s6] sm:$0xff] }
  0x31   : > { %301 = vmatmul.f32.vlgmr.msrb.gmra.mxu1 %v226_v12 }
  0x32   : > { %327 = vmatmul.f32.gmra.mxu2 %v231_v13 }
  0x33   : > { %350 = vmatmul.f32.gmra.mxu3 %v232_v14 }
  0x39   : > { %304 = vmatmul.f32.gmra.mxu1 %v228_v9 }
  0x97   : > { %v246_v21 = vpop.xlane.xlu0 %245 }
  0x98   : > { %v243_v22 = vpop.xlane.xlu1 %242 }
  0x9f   : > { %v252_v24 = vpop.xlane.xlu0 %251 }
  0xa0   : > { %v256_v25 = vadd.f32 %v252_v24, %v246_v21  ;;  %v249_v27 = vpop.xlane.xlu1 %248 }
  0xa1   : > { %v255_v28 = vadd.f32 %v249_v27, %v243_v22 }
  0xa2   : > { %v258_v29 = vadd.f32 %v256_v25, %v254_v23 }
  0xa3   : > { %v257_v30 = vadd.f32 %v255_v28, %v253_v26 }
  0xa4   : > { %261 = vst.msk [vmem:[%s694_s3 + $0x8] sm:$0xff] %vm235_vm0, %v258_v29 }
  0xa5   : > { %260 = vst.msk [vmem:[%s694_s3] sm:$0xff] %vm235_vm0, %v257_v30 }
  0xa6   : > { %v282_v31 = vpop.f32.mrf.mxu1  ;;  %v279_v35 = vpop.f32.mrf.mxu0 }
  0xab   : > { %v370_v32 = vld [vmem:[%s694_s3 + $0x8] sm:$0xff] }
  0xac   : > { %v372_v33 = vmul.f32 0.001953125, %v370_v32  ;;  %v369_v34 = vld [vmem:[%s694_s3] sm:$0xff] }
  0xad   : > { %v371_v36 = vmul.f32 0.001953125, %v369_v34  ;;  %v325_v37 = vpop.f32.mrf.mxu2 }
  0xae   : > { %v348_v38 = vpop.f32.mrf.mxu3  ;;  %535 = vmatpush.xpose.msk.msrb.mxu0 %vm235_vm0, %v372_v33  ;;  %411 = vst.msk [vmem:[%s694_s3 + $0x8] sm:$0xff] %vm235_vm0, %v372_v33  ;;  %v302_v39 = vpop.f32.mrf.mxu1 }
  0xaf   : > { %v349_v40 = vadd.f32 %v348_v38, %v325_v37  ;;  %410 = vst.msk [vmem:[%s694_s3] sm:$0xff] %vm235_vm0, %v371_v36  ;;  %v303_v41 = vadd.f32 %v302_v39, %v279_v35 }
  0xb1   : > { %v358_v42 = vsel %vm238_vm1, %v349_v40, 0.0  ;;  %v357_v44 = vsel %vm238_vm1, %v303_v41, 0.0 }
  0xb2   : > { %536 = vmatpush.xpose.msk.msrb.mxu0 %vm235_vm0, %v371_v36  ;;  %v359_v45 = vadd.f32 %v358_v42, %v357_v44 }
  0xb4   : > { %v363_v46 = vadd.f32 %v359_v45, %v354_v43 }
  0xb5   : > { %537 = vmatmul.msk.f32.vlgmr.msrb.gmra.mxu0 %vm235_vm0, %v371_v36  ;;  %v328_v47 = vpop.f32.mrf.mxu2 }
  0xb6   : > { %v351_v48 = vpop.f32.mrf.mxu3  ;;  %v305_v49 = vpop.f32.mrf.mxu1  ;;  %365 = vst.msk [vmem:[%s703_s6] sm:$0xff] %vm238_vm1, %v363_v46 }
  0xb7   : > { %v352_v50 = vadd.f32 %v351_v48, %v328_v47  ;;  %v306_v51 = vadd.f32 %v305_v49, %v282_v31 }
  0xb9   : > { %v361_v52 = vsel %vm238_vm1, %v352_v50, 0.0  ;;  %v360_v53 = vsel %vm238_vm1, %v306_v51, 0.0 }
  0xba   : > { %v362_v55 = vadd.f32 %v361_v52, %v360_v53 }
  0xbc   : > { %v364_v56 = vadd.f32 %v362_v55, %v355_v54 }
  0xbd   : > { %538 = vmatmul.msk.f32.gmra.mxu0 %vm235_vm0, %v372_v33  ;;  %v402_v57 = vld [vmem:[%s703_s6] sm:$0xff] }
  0xbe   : > { %366 = vst.msk [vmem:[%s703_s6 + $0x8] sm:$0xff] %vm238_vm1, %v364_v56  ;;  %v404_v58 = vmul.f32 0.001953125, %v402_v57 }
  0xc5   : > { %v403_v61 = vld [vmem:[%s703_s6 + $0x8] sm:$0xff] }
  0xc6   : > { %v405_v62 = vmul.f32 0.001953125, %v403_v61 }
 0x132   : > { %v396_v59 = vpop.f32.mrf.mxu0 }
 0x133   : > { %v406_v60 = vsub.f32 %v404_v58, %v396_v59 }
 0x135   : > { %408 = vst.msk [vmem:[%s703_s6] sm:$0xff] %vm238_vm1, %v406_v60 }
 0x13a   : > { %v399_v63 = vpop.f32.mrf.mxu0 }
 0x13b   : > { %v407_v0 = vsub.f32 %v405_v62, %v399_v63 }
 0x13d   : > { %409 = vst.msk [vmem:[%s703_s6 + $0x8] sm:$0xff] %vm238_vm1, %v407_v0 }
 0x13e PF: > { %s13_s13 = sadd.s32 1, %s625_s13   ;;  %s759_s9 = smov %s613_s10 }
 0x13f   : > { %p10_p10 = scmp.ge.s32.totalorder %s13_s13, 4   ;;  %s760_s10 = smov %s678_s17 }
 0x140   : > { %s761_s11 = smov %s621_s12  ;;  %s762_s12 = smov %s764_s14 }
 0x141   :  { %12 = sbr.rel (!%p10_p10) target bundleno = 3 (0x3), region = 102 }

// kernel: switch_whiten_2d.3
= control target key start
LH: loop header
LB: loop body
LE: loop exit
PB: predicated region body
PF: predicated region fallthrough
CT: control target
= control target key end

     0   :  { %11 = vsyncpa [#allocation3], 0  ;;  %s1160_s21 = smov 0   ;;  %s1306_s0 = inlined_call_operand.vmem [shape: f32[4,16,256], index: 0, kind: input, shape index: {}, may-alias: {0,6}]   ;;  %s1307_s1 = inlined_call_operand.vmem [shape: f32[2,16,1], index: 1, kind: input, shape index: {}]   ;;  %s1308_s2 = inlined_call_operand.vmem [shape: f32[2,16,16], index: 2, kind: input, shape index: {}]   ;;  %s1309_s3 = inlined_call_operand.vmem [shape: f32[2,16,1], index: 3, kind: input, shape index: {}]   ;;  %s1310_s4 = inlined_call_operand.vmem [shape: f32[2,16,1], index: 4, kind: input, shape index: {}]   ;;  %s1311_s5 = inlined_call_operand.vmem [shape: f32[4], index: 5, kind: input, shape index: {}]   ;;  %s1312_s6 = inlined_call_operand.vmem [shape: f32[4,16,256], index: 6, kind: output, shape index: {}, may-alias: {0,6}]  }
   0x1 LB: > { %s1166_s22 = sadd.s32 4294967295, %s1120_s21   ;;  %p1007_p0 = scmp.ge.s32.totalorder %s1120_s21, 1  ;;  %s1120_s21 = sphi %s1160_s21, %s17_s21  }
   0x2   : > { %p179_p1 = scmp.lt.s32.totalorder %s1120_s21, 5  ;;  %s203_s25 = sshll.u32 %s1311_s5, 4  ;;  %s204_s25 = int_to_ptr.vmem [resolvable:$true] %s203_s25 }
   0x3   : > { %p1075_p3 = scmp.eq.s32.totalorder %s1166_s22, 0  ;;  %s1122_s26 = smov [#allocation2]  }
   0x4   : > { %p180_p2 = pnand %p1007_p0, %p179_p1 }
   0x6   : > { %p1071_p4 = pneg %p180_p2  ;;  %224 = sbr.rel (%p180_p2) target bundleno = 2311 (0x907), region = 44 }
   0x8   : > { %p1072_p5 = pnand %p1075_p3, %p1071_p4 }
   0xa   : > { %1074 = dma.vmem_to_smem (!%p1072_p5), %s204_s25, 16, %s1122_s26, [#allocation3]  }
   0xb   : > { %1115 = dma.done.wait (%p1075_p3), [#allocation3], 16  }
   0xc   : > { %1117 = vsyncadd (%p1075_p3), [#allocation3], 4294967280 }
   0xd   : > { %231 = sfence }
   0xe   : > { %p256_p6 = scmp.lt.s32.totalorder %s1166_s22, 3  ;;  %vm355_vm0 = vcmask 7168   ;;  %s271_s8 = ssub.s32 0, %s1166_s22  ;;  %v387_v14 = vlaneseq  ;;  %v1123_v28 = vmov 0.0   ;;  %vm420_vm3 = vcmask 130048  }
   0xf   : > { %s1016_s9 = smin.u32 %s1166_s22, %s271_s8  ;;  %p270_p7 = scmp.lt.s32.totalorder %s1166_s22, 0 }
  0x10   : > { %s1176_s27 = scalar_select %p256_p6, %s1166_s22, 3  ;;  %v388_v16 = vshrl.u32 %v387_v14, 7  ;;  %v391_v17 = vand.u32 127, %v387_v14 }
  0x11   : > { %s273_s10 = sand.u32 1, %s1016_s9   ;;  %s1021_s13 = sld [smem:[#allocation2 + $0x2]] }
  0x12   : > { %s1061_s28 = sshll.u32 %s1176_s27, 5  ;;  %s274_s11 = ssub.s32 0, %s273_s10  ;;  %v389_v24 = vadd.s32 8, %v388_v16  ;;  %vm392_vm1 = vcmp.eq.s32.totalorder %v388_v16, %v391_v17 }
  0x13   : > { %s260_s7 = scalar_lea.vmem %s1306_s0, %s1061_s28  ;;  %s1314_s11 = smov (!%p270_p7, %s274_s11), %s273_s10  ;;  %v1027_v29 = vsel %vm392_vm1, 1.0, %v1123_v28 }
  0x14   : > { %v1184_v0 = vld [vmem:[%s260_s7 + $0x10] sm:$0xff]  ;;  %v1186_v1 = vld [vmem:[%s260_s7 + $0x18] sm:$0xff]  ;;  %v1192_v3 = vld [vmem:[%s260_s7] sm:$0xff]  ;;  %p1018_p8 = scmp.lt.s32.totalorder %s1314_s11, 0  ;;  %s280_s12 = sadd.s32 2, %s1314_s11  ;;  %vm393_vm2 = vcmp.eq.s32.totalorder %v389_v24, %v391_v17  ;;  %v435_v59 = vmul.f32 1.5, %v1027_v29 }
  0x15   : > { %v302_v2 = vadd.f32 %v1186_v1, %v1184_v0  ;;  %1063 = vmatpush.xpose.msra.mxu1 %v1184_v0  ;;  %321 = vmatpush.xpose.msra.mxu0 %v1184_v0  ;;  %v1194_v4 = vld [vmem:[%s260_s7 + $0x8] sm:$0xff]  ;;  %s1022_s14 = sld [smem:[#allocation2 + $0x3]]  ;;  %v414_v33 = vmul.f32 1e-05, %v1027_v29  ;;  %v1028_v35 = vsel %vm393_vm2, 1.0, %v1123_v28 }
  0x16   : > { %v299_v5 = vadd.f32 %v1194_v4, %v1192_v3  ;;  %s1316_s12 = smov (!%p1018_p8, %s280_s12), %s1314_s11  ;;  %v415_v39 = vmul.f32 1e-05, %v1028_v35  ;;  %v436_v56 = vmul.f32 1.5, %v1028_v35  ;;  %s295_s19 = sld [smem:[#allocation2]] }
  0x17   : > { %303 = vadd.xlane.f32.xlu0 %v302_v2  ;;  %s1217_s15 = sshll.u32 %s1316_s12, 4  ;;  %v406_v21 = vstv %s1021_s13  ;;  %s1020_s20 = sld [smem:[#allocation2 + $0x1]] }
  0x18   : > { %s286_s18 = scalar_lea.vmem %s1308_s2, %s1217_s15  ;;  %s283_s24 = scalar_lea.vmem %s1307_s1, %s1217_s15 }
  0x19   : > { %1064 = vmatpush.xpose.msra.mxu1 %v1192_v3  ;;  %322 = vmatpush.xpose.msra.mxu0 %v1192_v3  ;;  %v287_v19 = vld [vmem:[%s286_s18] sm:$0xff]  ;;  %v288_v30 = vld [vmem:[%s286_s18 + $0x8] sm:$0xff]  ;;  %s289_s29 = scalar_lea.vmem %s1309_s3, %s1217_s15  ;;  %s292_s8 = scalar_lea.vmem %s1310_s4, %s1217_s15 }
  0x1a   : > { %v407_v26 = vmul.f32 %v406_v21, %v287_v19  ;;  %v408_v37 = vmul.f32 %v406_v21, %v288_v30  ;;  %v284_v21 = vld [vmem:[%s283_s24] sm:$0xff]  ;;  %s265_s11 = scalar_lea.vmem %s1312_s6, %s1061_s28 }
  0x1b   : > { %v409_v22 = vstv %s1022_s14 }
  0x1c   : > { %326 = vmatmul.f32.vlgmr.msra.gmra.mxu1 %v1184_v0  ;;  %323 = vmatmul.f32.vlgmr.msra.gmra.mxu0 %v1192_v3  ;;  %v398_v19 = vstv %s295_s19 }
  0x1d   : > { %344 = vmatpush.xpose.msrb.mxu1 %v1186_v1 }
  0x1f   : > { %300 = vadd.xlane.f32.xlu0 %v299_v5 }
  0x21   : > { %345 = vmatpush.xpose.msrb.mxu1 %v1194_v4 }
  0x24   : > { %346 = vmatmul.f32.vlgmr.msrb.gmra.mxu1 %v1194_v4 }
  0x2c   : > { %349 = vmatmul.f32.gmra.mxu1 %v1186_v1 }
  0x8a   : > { %v304_v6 = vpop.xlane.xlu0 %303 }
  0x8b   : > { %v1206_v7 = vmul.f32 0.00390625, %v304_v6 }
  0x8d   : > { %1023 = vmatpush.xpose.msk.msra.mxu2 %vm355_vm0, %v1206_v7 }
  0x92   : > { %v301_v8 = vpop.xlane.xlu0 %300 }
  0x93   : > { %v1209_v9 = vmul.f32 0.00390625, %v301_v8 }
  0x95   : > { %1024 = vmatpush.xpose.msk.msra.mxu2 %vm355_vm0, %v1209_v9 }
  0x98   : > { %1025 = vmatmul.msk.f32.vlgmr.msra.gmra.mxu2 %vm355_vm0, %v1209_v9 }
  0x99   : > { %v327_v10 = vpop.f32.mrf.mxu1  ;;  %v324_v12 = vpop.f32.mrf.mxu0 }
  0xa0   : > { %1026 = vmatmul.msk.f32.gmra.mxu2 %vm355_vm0, %v1206_v7 }
  0xa1   : > { %v347_v11 = vpop.f32.mrf.mxu1 }
  0xa2   : > { %v348_v13 = vadd.f32 %v347_v11, %v324_v12 }
  0xa4   : > { %v353_v15 = vmul.f32 0.00390625, %v348_v13 }
  0xa9   : > { %v350_v18 = vpop.f32.mrf.mxu1 }
  0xaa   : > { %v351_v25 = vadd.f32 %v350_v18, %v327_v10  ;;  %v285_v18 = vld [vmem:[%s283_s24 + $0x8] sm:$0xff] }
  0xac   : > { %v354_v31 = vmul.f32 0.00390625, %v351_v25  ;;  %v399_v25 = vmul.f32 %v398_v19, %v284_v21 }
 0x11b   : > { %v379_v20 = vpop.f32.mrf.mxu2 }
 0x11c   : > { %v385_v23 = vsub.f32 %v353_v15, %v379_v20  ;;  %v401_v20 = vstv %s1020_s20 }
 0x11d   : > { %v402_v24 = vmul.f32 %v401_v20, %v1209_v9 }
 0x11e   : > { %v410_v27 = vmul.f32 %v409_v22, %v385_v23  ;;  %v403_v23 = vmul.f32 %v401_v20, %v1206_v7 }
 0x11f   : > { %v404_v28 = vadd.f32 %v402_v24, %v399_v25 }
 0x120   : > { %v412_v32 = vadd.f32 %v410_v27, %v407_v26 }
 0x122   : > { %v416_v40 = vadd.f32 %v414_v33, %v412_v32 }
 0x123   : > { %v382_v34 = vpop.f32.mrf.mxu2 }
 0x124   : > { %v386_v36 = vsub.f32 %v354_v31, %v382_v34  ;;  %v418_v43 = vmul.f32 %v1027_v29, %v416_v40 }
 0x126   : > { %v411_v38 = vmul.f32 %v409_v22, %v386_v36  ;;  %v421_v45 = vsel %vm420_vm3, %v418_v43, 0.0  ;;  %v400_v22 = vmul.f32 %v398_v19, %v285_v18 }
 0x128   : > { %v413_v41 = vadd.f32 %v411_v38, %v408_v37  ;;  %v405_v26 = vadd.f32 %v403_v23, %v400_v22  ;;  %v294_v22 = vld [vmem:[%s292_s8 + $0x8] sm:$0xff] }
 0x12a   : > { %v417_v42 = vadd.f32 %v415_v39, %v413_v41 }
 0x12c   : > { %v419_v44 = vmul.f32 %v1028_v35, %v417_v42 }
 0x12e   : > { %v422_v46 = vsel %vm420_vm3, %v419_v44, 0.0 }
 0x12f   : > { %v423_v47 = vadd.f32 %v422_v46, %v421_v45 }
 0x131   : > { %424 = vadd.xlane.f32.xlu1 %v423_v47 }
 0x1a4   : > { %v425_v48 = vpop.xlane.xlu1 %424 }
 0x1a5   : > { %v426_v49 = vrot.slane %v425_v48, 4 }
 0x1a7   : > { %v427_v50 = vadd.f32 %v426_v49, %v425_v48 }
 0x1a9   : > { %v428_v51 = vrot.slane %v427_v50, 2 }
 0x1ab   : > { %v429_v52 = vadd.f32 %v428_v51, %v427_v50 }
 0x1ad   : > { %v430_v53 = vrot.slane %v429_v52, 1 }
 0x1af   : > { %v431_v54 = vadd.f32 %v430_v53, %v429_v52  ;;  %v290_v52 = vld [vmem:[%s289_s29] sm:$0xff]  ;;  %v1124_v53 = vmov 0  }
 0x1b0   : > { %1088 = vset.pattern.permute.xlu1 %v1124_v53  ;;  %1089 = vset.pattern.permute.xlu2 %v1124_v53 }
 0x1b1   : > { %1091 = vrcp.f32 %v431_v54  ;;  %829 = vperm.xlu1 %1088, %v290_v52   ;;  %1090 = vset.pattern.permute.xlu0 %v1124_v53 }
 0x1b7   : > { %v1225_v55 = vpop.eup %1091 }
 0x1b8   : > { %v1228_v57 = vmul.f32 %v1225_v55, %v417_v42  ;;  %v1231_v58 = vmul.f32 %v1225_v55, %v416_v40  ;;  %1093 = vrsqrt.f32 %v1225_v55  ;;  %vm820_vm4 = vcmp.eq.f32.partialorder %v1225_v55, inf }
 0x1b9   : > { %vm822_vm5 = vcmp.eq.f32.partialorder %v1225_v55, 0.0 }
 0x1ba   : > { %521 = vmatpush.msrb.mxu0 %v1228_v57  ;;  %v438_v60 = vmul.f32 0.5, %v1228_v57  ;;  %v437_v61 = vmul.f32 0.5, %v1231_v58 }
 0x1bc   : > { %522 = vmatpush.msrb.mxu0 %v1231_v58  ;;  %v440_v62 = vsub.f32 %v436_v56, %v438_v60  ;;  %v439_v63 = vsub.f32 %v435_v59, %v437_v61 }
 0x1be   : > { %461 = vmatpush.msrb.mxu2 %v440_v62  ;;  %1065 = vmatpush.msra.mxu3 %v440_v62  ;;  %v500_v13 = vmul.f32 1.5, %v440_v62  ;;  %v499_v15 = vmul.f32 1.5, %v439_v63 }
 0x1c0   : > { %462 = vmatpush.msrb.mxu2 %v439_v63  ;;  %1066 = vmatpush.msra.mxu3 %v439_v63 }
 0x1c1   : > { %1029 = vmatmul.msk.f32.vlgmr.msrb.gmra.mxu2 %vm420_vm3, %v439_v63  ;;  %1030 = vmatmul.msk.f32.vlgmr.msra.gmra.mxu3 %vm420_vm3, %v440_v62 }
 0x1c2   : > { %490 = vmatpush.msrb.mxu3 %v440_v62 }
 0x1c4   : > { %491 = vmatpush.msrb.mxu3 %v439_v63 }
 0x1c6   : > { %614 = vmatpush.msra.mxu3 %v1228_v57 }
 0x1c8   : > { %615 = vmatpush.msra.mxu3 %v1231_v58 }
 0x244   : > { %v464_v2 = vpop.f32.mrf.mxu2  ;;  %v467_v5 = vpop.f32.mrf.mxu3 }
 0x245   : > { %1031 = vmatmul.msk.f32.vlgmr.msrb.gmra.mxu3 %vm420_vm3, %v464_v2 }
 0x24d   : > { %1032 = vmatmul.msk.f32.gmra.mxu3 %vm420_vm3, %v467_v5  ;;  %v823_v5 = vand.u32 2147483648, %v1225_v55 }
 0x2c8   : > { %v493_v6 = vpop.f32.mrf.mxu3 }
 0x2c9   : > { %1033 = vmatmul.msk.f32.vlgmr.msrb.gmra.mxu0 %vm420_vm3, %v493_v6 }
 0x2d0   : > { %v496_v8 = vpop.f32.mrf.mxu3 }
 0x2d1   : > { %1034 = vmatmul.msk.f32.gmra.mxu0 %vm420_vm3, %v496_v8 }
 0x346   : > { %v524_v10 = vpop.f32.mrf.mxu0 }
 0x347   : > { %v530_v12 = vmul.f32 0.5, %v524_v10  ;;  %v830_v10 = vpop.permute.xlu1 %829 }
 0x349   : > { %v532_v17 = vsub.f32 %v499_v15, %v530_v12 }
 0x34b   : > { %v592_v35 = vmul.f32 1.5, %v532_v17 }
 0x34e   : > { %v527_v11 = vpop.f32.mrf.mxu0 }
 0x34f   : > { %v531_v14 = vmul.f32 0.5, %v527_v11 }
 0x351   : > { %v533_v16 = vsub.f32 %v500_v13, %v531_v14 }
 0x353   : > { %554 = vmatpush.msra.mxu1 %v533_v16  ;;  %583 = vmatpush.msra.mxu2 %v533_v16  ;;  %v593_v33 = vmul.f32 1.5, %v533_v16 }
 0x355   : > { %555 = vmatpush.msra.mxu1 %v532_v17  ;;  %584 = vmatpush.msra.mxu2 %v532_v17 }
 0x356   : > { %1035 = vmatmul.msk.f32.vlgmr.msra.gmra.mxu1 %vm420_vm3, %v532_v17 }
 0x357   : > { %707 = vmatpush.msrb.mxu2 %v1228_v57 }
 0x359   : > { %708 = vmatpush.msrb.mxu2 %v1231_v58 }
 0x35e   : > { %1036 = vmatmul.msk.f32.gmra.mxu1 %vm420_vm3, %v533_v16 }
 0x3d3   : > { %v557_v27 = vpop.f32.mrf.mxu1 }
 0x3d4   : > { %1037 = vmatmul.msk.f32.vlgmr.msra.gmra.mxu2 %vm420_vm3, %v557_v27 }
 0x3d5   : > { %859 = vmatpush.msra.mxu2 %v405_v26 }
 0x3d7   : > { %860 = vmatpush.msra.mxu2 %v404_v28 }
 0x3db   : > { %v560_v29 = vpop.f32.mrf.mxu1 }
 0x3dc   : > { %1038 = vmatmul.msk.f32.gmra.mxu2 %vm420_vm3, %v560_v29 }
 0x457   : > { %v586_v30 = vpop.f32.mrf.mxu2 }
 0x458   : > { %1039 = vmatmul.msk.f32.vlgmr.msra.gmra.mxu3 %vm420_vm3, %v586_v30 }
 0x45f   : > { %v589_v31 = vpop.f32.mrf.mxu2 }
 0x460   : > { %1040 = vmatmul.msk.f32.gmra.mxu3 %vm420_vm3, %v589_v31 }
 0x4db   : > { %v617_v7 = vpop.f32.mrf.mxu3 }
 0x4dc   : > { %v623_v9 = vmul.f32 0.5, %v617_v7 }
 0x4de   : > { %v625_v37 = vsub.f32 %v592_v35, %v623_v9 }
 0x4e0   : > { %v685_v47 = vmul.f32 1.5, %v625_v37 }
 0x4e3   : > { %v620_v32 = vpop.f32.mrf.mxu3 }
 0x4e4   : > { %v624_v34 = vmul.f32 0.5, %v620_v32 }
 0x4e6   : > { %v626_v36 = vsub.f32 %v593_v33, %v624_v34 }
 0x4e8   : > { %647 = vmatpush.msra.mxu0 %v626_v36  ;;  %676 = vmatpush.msrb.mxu1 %v626_v36  ;;  %v686_v45 = vmul.f32 1.5, %v626_v36 }
 0x4ea   : > { %648 = vmatpush.msra.mxu0 %v625_v37  ;;  %677 = vmatpush.msrb.mxu1 %v625_v37 }
 0x4eb   : > { %1041 = vmatmul.msk.f32.vlgmr.msra.gmra.mxu0 %vm420_vm3, %v625_v37 }
 0x4ec   : > { %800 = vmatpush.msra.mxu1 %v1228_v57 }
 0x4ee   : > { %801 = vmatpush.msra.mxu1 %v1231_v58 }
 0x4f3   : > { %1042 = vmatmul.msk.f32.gmra.mxu0 %vm420_vm3, %v626_v36 }
 0x568   : > { %v650_v38 = vpop.f32.mrf.mxu0 }
 0x569   : > { %1043 = vmatmul.msk.f32.vlgmr.msrb.gmra.mxu1 %vm420_vm3, %v650_v38 }
 0x570   : > { %v653_v39 = vpop.f32.mrf.mxu0 }
 0x571   : > { %1044 = vmatmul.msk.f32.gmra.mxu1 %vm420_vm3, %v653_v39 }
 0x5e6   : > { %v679_v40 = vpop.f32.mrf.mxu1 }
 0x5e7   : > { %1045 = vmatmul.msk.f32.vlgmr.msrb.gmra.mxu2 %vm420_vm3, %v679_v40 }
 0x5ee   : > { %v682_v41 = vpop.f32.mrf.mxu1 }
 0x5ef   : > { %1046 = vmatmul.msk.f32.gmra.mxu2 %vm420_vm3, %v682_v41 }
 0x66a   : > { %v710_v42 = vpop.f32.mrf.mxu2 }
 0x66b   : > { %v716_v44 = vmul.f32 0.5, %v710_v42 }
 0x66d   : > { %v718_v49 = vsub.f32 %v685_v47, %v716_v44 }
 0x66f   : > { %v778_v62 = vmul.f32 1.5, %v718_v49 }
 0x672   : > { %v713_v43 = vpop.f32.mrf.mxu2 }
 0x673   : > { %v717_v46 = vmul.f32 0.5, %v713_v43 }
 0x675   : > { %v719_v48 = vsub.f32 %v686_v45, %v717_v46 }
 0x677   : > { %740 = vmatpush.msrb.mxu3 %v719_v48  ;;  %769 = vmatpush.msrb.mxu0 %v719_v48  ;;  %v779_v14 = vmul.f32 1.5, %v719_v48 }
 0x679   : > { %741 = vmatpush.msrb.mxu3 %v718_v49  ;;  %770 = vmatpush.msrb.mxu0 %v718_v49 }
 0x67a   : > { %1047 = vmatmul.msk.f32.vlgmr.msrb.gmra.mxu3 %vm420_vm3, %v718_v49 }
 0x67b   : > { %917 = vmatpush.msra.mxu0 %v1186_v1  ;;  %894 = vmatpush.msra.mxu3 %v1184_v0  ;;  %v291_v1 = vld [vmem:[%s289_s29 + $0x8] sm:$0xff] }
 0x67c   : > { %834 = vperm.xlu2 %1089, %v291_v1  }
 0x67d   : > { %918 = vmatpush.msra.mxu0 %v1194_v4  ;;  %895 = vmatpush.msra.mxu3 %v1192_v3  ;;  %v1094_v4 = vpop.eup %1093 }
 0x67e   : > { %v814_v54 = vmul.f32 %v1094_v4, %v1225_v55 }
 0x680   : > { %v815_v56 = vmul.f32 %v1094_v4, %v814_v54 }
 0x682   : > { %1048 = vmatmul.msk.f32.gmra.mxu3 %vm420_vm3, %v719_v48  ;;  %v816_v57 = vmul.f32 0.5, %v815_v56 }
 0x684   : > { %v817_v58 = vsub.f32 1.5, %v816_v57 }
 0x686   : > { %v818_v59 = vmul.f32 %v1094_v4, %v817_v58 }
 0x688   : > { %v819_v60 = vmul.f32 %v1225_v55, %v818_v59 }
 0x68a   : > { %v821_v2 = vsel %vm820_vm4, %v1225_v55, %v819_v60  ;;  %v293_v55 = vld [vmem:[%s292_s8] sm:$0xff] }
 0x68b   : > { %v824_v8 = vsel %vm822_vm5, %v823_v5, %v821_v2 }
 0x6d6   : > { %v835_v17 = vpop.permute.xlu2 %834 }
 0x6fd   : > { %v743_v50 = vpop.f32.mrf.mxu3 }
 0x6fe   : > { %1049 = vmatmul.msk.f32.vlgmr.msrb.gmra.mxu0 %vm420_vm3, %v743_v50 }
 0x705   : > { %v746_v51 = vpop.f32.mrf.mxu3 }
 0x706   : > { %1050 = vmatmul.msk.f32.gmra.mxu0 %vm420_vm3, %v746_v51 }
 0x77b   : > { %v772_v0 = vpop.f32.mrf.mxu0 }
 0x77c   : > { %1051 = vmatmul.msk.f32.vlgmr.msra.gmra.mxu1 %vm420_vm3, %v772_v0 }
 0x783   : > { %v775_v3 = vpop.f32.mrf.mxu0 }
 0x784   : > { %1052 = vmatmul.msk.f32.gmra.mxu1 %vm420_vm3, %v775_v3 }
 0x7f9   : > { %v803_v61 = vpop.f32.mrf.mxu1 }
 0x7fa   : > { %v809_v63 = vmul.f32 0.5, %v803_v61 }
 0x7fc   : > { %v811_v6 = vsub.f32 %v778_v62, %v809_v63 }
 0x7fe   : > { %v825_v11 = vmul.f32 %v824_v8, %v811_v6 }
 0x800   : > { %v837_v12 = vmul.f32 %v830_v10, %v825_v11 }
 0x801   : > { %v806_v13 = vpop.f32.mrf.mxu1 }
 0x802   : > { %v810_v15 = vmul.f32 0.5, %v806_v13  ;;  %1053 = vmatmul.msk.f32.vlgmr.msra.gmra.mxu2 %vm420_vm3, %v837_v12  ;;  %1055 = vmatmul.msk.f32.vlgmr.msra.gmra.mxu3 %vm420_vm3, %v837_v12 }
 0x803   : > { %1057 = vmatmul.msk.f32.vlgmr.msra.gmra.mxu0 %vm420_vm3, %v837_v12 }
 0x804   : > { %v812_v16 = vsub.f32 %v779_v14, %v810_v15 }
 0x806   : > { %v826_v18 = vmul.f32 %v824_v8, %v812_v16 }
 0x808   : > { %v838_v19 = vmul.f32 %v835_v17, %v826_v18 }
 0x80a   : > { %1054 = vmatmul.msk.f32.gmra.mxu2 %vm420_vm3, %v838_v19  ;;  %1056 = vmatmul.msk.f32.gmra.mxu3 %vm420_vm3, %v838_v19 }
 0x80b   : > { %1058 = vmatmul.msk.f32.gmra.mxu0 %vm420_vm3, %v838_v19 }
 0x880   : > { %v920_v25 = vpop.f32.mrf.mxu0 }
 0x885   : > { %v862_v20 = vpop.f32.mrf.mxu2  ;;  %v897_v26 = vpop.f32.mrf.mxu3 }
 0x886   : > { %v868_v21 = vsub.f32 %v293_v55, %v862_v20 }
 0x888   : > { %872 = vperm.xlu2 %1089, %v868_v21   ;;  %v923_v30 = vpop.f32.mrf.mxu0 }
 0x88d   : > { %v865_v23 = vpop.f32.mrf.mxu2  ;;  %v900_v31 = vpop.f32.mrf.mxu3 }
 0x88e   : > { %v869_v24 = vsub.f32 %v294_v22, %v865_v23 }
 0x890   : > { %877 = vperm.xlu0 %1090, %v869_v24  }
 0x8e2   : > { %v873_v27 = vpop.permute.xlu2 %872 }
 0x8e3   : > { %v898_v28 = vadd.f32 %v897_v26, %v873_v27  ;;  %v921_v29 = vadd.f32 %v920_v25, %v873_v27 }
 0x8e5   : > { %926 = vst [vmem:[%s265_s11] sm:$0xff] %v898_v28 }
 0x8e6   : > { %927 = vst [vmem:[%s265_s11 + $0x8] sm:$0xff] %v921_v29 }
 0x902   : > { %v878_v7 = vpop.permute.xlu0 %877 }
 0x903   : > { %v901_v32 = vadd.f32 %v900_v31, %v878_v7  ;;  %v924_v9 = vadd.f32 %v923_v30, %v878_v7 }
 0x905   : > { %928 = vst [vmem:[%s265_s11 + $0x10] sm:$0xff] %v901_v32 }
 0x906   : > { %929 = vst [vmem:[%s265_s11 + $0x18] sm:$0xff] %v924_v9 }
 0x907 PF: > { %s17_s21 = sadd.s32 1, %s1120_s21  }
 0x908   : > { %p14_p9 = scmp.ge.s32.totalorder %s17_s21, 6  }
 0x90a   :  { %16 = sbr.rel (!%p14_p9) target bundleno = 1 (0x1), region = 83 }
 0x90f   :  { %951 = vsyncpa [#allocation3], 1 }
 0x910   :  { %953 = vsyncpa [#allocation3 + $0x1], 1 }

</bundles_post_ra>
